<compile_context>
chip_gen: v7x
topology: tpu7x:2x2x1
jax: 0.10.0
libtpu: 0.0.40
codegen_flags: <defaults>
</compile_context>

<pallas_src>
import jax
import jax.numpy as jnp
import numpy as np
from jax.experimental import pallas as pl
from jax.experimental.pallas import tpu as pltpu


# --------------------------------------------------------------------------
# Kernels
# --------------------------------------------------------------------------
def _encode_kernel(embs_ref, w1_t_ref, w1e_ref):
    """Step-invariant encoder projection: w1e = embs @ w1_t  (bf16 in/out, f32 acc)."""
    B, S, E = embs_ref.shape
    embs2d = embs_ref[...].reshape(B * S, E)                          # bf16
    w1e = jnp.dot(embs2d, w1_t_ref[...],
                  preferred_element_type=jnp.float32)                 # f32 acc
    w1e_ref[...] = w1e.reshape(B, S, E).astype(w1e_ref.dtype)


def _pointer_step_kernel(x_ref, h0_ref, w1e_ref, addmask_ref,
                         wih_t_ref, whh_t_ref, bih_ref, bhh_ref,
                         w2_t_ref, v_ref,
                         logits_ref, h_ref):
    BB, S, E = w1e_ref.shape

    x = x_ref[...]                         # (BB, E) f32
    h0 = h0_ref[...]                       # (BB, E) f32

    # ---- GRUCell (PyTorch gate order: r, z, n); bf16 MXU, f32 accumulate ----
    gi = jnp.dot(x.astype(jnp.bfloat16), wih_t_ref[...],
                 preferred_element_type=jnp.float32) + bih_ref[...]   # (BB, 3E)
    gh = jnp.dot(h0.astype(jnp.bfloat16), whh_t_ref[...],
                 preferred_element_type=jnp.float32) + bhh_ref[...]   # (BB, 3E)
    r = jax.nn.sigmoid(gi[:, 0 * E:1 * E] + gh[:, 0 * E:1 * E])
    z = jax.nn.sigmoid(gi[:, 1 * E:2 * E] + gh[:, 1 * E:2 * E])
    n = jnp.tanh(gi[:, 2 * E:3 * E] + r * gh[:, 2 * E:3 * E])
    h = (1.0 - z) * n + z * h0                                        # (BB, E) f32
    h_ref[...] = h

    # ---- Additive attention scores (w1e precomputed outside) ----
    w2h = jnp.dot(h.astype(jnp.bfloat16), w2_t_ref[...],
                  preferred_element_type=jnp.float32)                 # (BB, E)
    t = jnp.tanh(w1e_ref[...].astype(jnp.float32) + w2h[:, None, :])  # (BB, S, E)
    scores = jnp.sum(t * v_ref[...][None, :, :], axis=-1)             # (BB, S)

    # ---- additive mask + log-softmax over last dim ----
    scores = scores + addmask_ref[...]
    mx = jnp.max(scores, axis=-1, keepdims=True)
    sh = scores - mx
    lse = jnp.log(jnp.sum(jnp.exp(sh), axis=-1, keepdims=True))
    logits_ref[...] = sh - lse


# --------------------------------------------------------------------------
# Pallas call wrappers
# --------------------------------------------------------------------------
def _precompute_w1e(embs_bf16, w1_t_bf16):
    Bp, S, E = embs_bf16.shape
    vmem = pl.BlockSpec(memory_space=pltpu.MemorySpace.VMEM)
    return pl.pallas_call(
        _encode_kernel,
        out_shape=jax.ShapeDtypeStruct((Bp, S, E), jnp.bfloat16),
        in_specs=[vmem, vmem],
        out_specs=vmem,
    )(embs_bf16, w1_t_bf16)


def _pointer_step(x, h0, w1e, addmask, wih_t, whh_t, bih, bhh, w2_t, v):
    Bp, S, E = w1e.shape
    BB = 8                                   # f32 sublane count
    nb = Bp // BB

    bmap2 = lambda i: (i, 0)
    bmap3 = lambda i: (i, 0, 0)
    wmap = lambda i: (0, 0)                  # weights: same block every step -> VMEM-resident

    in_specs = [
        pl.BlockSpec((BB, E), bmap2),        # x
        pl.BlockSpec((BB, E), bmap2),        # h0
        pl.BlockSpec((BB, S, E), bmap3),     # w1e (bf16)
        pl.BlockSpec((BB, S), bmap2),        # additive mask
        pl.BlockSpec((E, 3 * E), wmap),      # wih_t (bf16)
        pl.BlockSpec((E, 3 * E), wmap),      # whh_t (bf16)
        pl.BlockSpec((1, 3 * E), wmap),      # bih (f32)
        pl.BlockSpec((1, 3 * E), wmap),      # bhh (f32)
        pl.BlockSpec((E, E), wmap),          # w2_t (bf16)
        pl.BlockSpec((1, E), wmap),          # v (f32)
    ]
    out_specs = (pl.BlockSpec((BB, S), bmap2),
                 pl.BlockSpec((BB, E), bmap2))

    cost = pl.CostEstimate(
        flops=int(2 * Bp * E * 3 * E * 2          # GRU input/hidden dots
                  + 2 * Bp * E * E                # w2 @ h
                  + 2 * Bp * S * E                # score reduce
                  + 16 * Bp * E + 8 * Bp * S),    # elementwise
        transcendentals=int(3 * Bp * E + Bp * S * E + Bp * S),
        bytes_accessed=int(2 * (E * 3 * E) * 2    # wih_t, whh_t (bf16)
                           + E * E * 2            # w2_t (bf16)
                           + (6 * E + E) * 4      # biases + v (f32)
                           + Bp * S * E * 2       # w1e (bf16)
                           + Bp * E * 8           # x, h0 (f32)
                           + Bp * S * 4           # mask
                           + Bp * S * 4 + Bp * E * 4),  # outputs
    )

    return pl.pallas_call(
        _pointer_step_kernel,
        out_shape=(jax.ShapeDtypeStruct((Bp, S), jnp.float32),
                   jax.ShapeDtypeStruct((Bp, E), jnp.float32)),
        grid=(nb,),
        in_specs=in_specs,
        out_specs=out_specs,
        compiler_params=pltpu.CompilerParams(dimension_semantics=("parallel",)),
        cost_estimate=cost,
    )(x, h0, w1e, addmask, wih_t, whh_t, bih, bhh, w2_t, v)


def pointer_net_forward(x, embs, hidden, mask, params, mask_fill_value=-10000.0):
    """Single forward step with the same semantics as PointerNet.forward."""
    B, S, E = embs.shape
    if hidden is None:
        hidden = jnp.zeros((B, E), jnp.float32)

    # Pad batch up to the sublane count (8) so vregs are fully utilized.
    Bp = max(8, ((B + 7) // 8) * 8)
    padB = Bp - B

    def padb(a):
        if padB == 0:
            return a
        return jnp.pad(a, ((0, padB),) + ((0, 0),) * (a.ndim - 1))

    x_p = padb(x.astype(jnp.float32))
    h_p = padb(hidden.astype(jnp.float32))
    embs_p = padb(embs).astype(jnp.bfloat16)

    if mask is None:
        addmask = jnp.zeros((Bp, S), jnp.float32)
    else:
        addmask = padb(mask.astype(jnp.float32)) * jnp.float32(mask_fill_value)

    # bf16 weights (f32 accumulation inside the kernels).
    wih_t = params["wih_t"].astype(jnp.bfloat16)
    whh_t = params["whh_t"].astype(jnp.bfloat16)
    w1_t = params["w1_t"].astype(jnp.bfloat16)
    w2_t = params["w2_t"].astype(jnp.bfloat16)

    # Step-invariant encoder projection (amortizable across a decode loop).
    w1e = _precompute_w1e(embs_p, w1_t)

    logits_p, h_new_p = _pointer_step(
        x_p, h_p, w1e, addmask,
        wih_t, whh_t, params["bih"], params["bhh"],
        w2_t, params["v"])
    return logits_p[:B], h_new_p[:B]


# --------------------------------------------------------------------------
# Pure-JAX reference (mirrors the PyTorch module, f32 throughout)
# --------------------------------------------------------------------------
def _ref_forward(x, embs, hidden, mask_bool, p, mask_fill_value=-10000.0):
    E = x.shape[1]
    gi = x @ p["wih_t"] + p["bih"][0]
    gh = hidden @ p["whh_t"] + p["bhh"][0]
    r = jax.nn.sigmoid(gi[:, :E] + gh[:, :E])
    z = jax.nn.sigmoid(gi[:, E:2 * E] + gh[:, E:2 * E])
    n = jnp.tanh(gi[:, 2 * E:] + r * gh[:, 2 * E:])
    h = (1.0 - z) * n + z * hidden
    t = jnp.tanh(embs @ p["w1_t"] + (h @ p["w2_t"])[:, None, :])
    scores = jnp.sum(t * p["v"][None, :, :], axis=-1)
    scores = jnp.where(mask_bool, mask_fill_value, scores)
    logits = jax.nn.log_softmax(scores, axis=-1)
    return logits, h


def init_params(key, embedding_dim):
    E = embedding_dim
    ks = jax.random.split(key, 7)
    scale = 1.0 / np.sqrt(E)
    u = lambda k, shape: jax.random.uniform(k, shape, jnp.float32, -scale, scale)
    return {
        # GRUCell: weight_ih (3E, E), weight_hh (3E, E) -> stored transposed
        "wih_t": u(ks[0], (E, 3 * E)),
        "whh_t": u(ks[1], (E, 3 * E)),
        "bih": u(ks[2], (1, 3 * E)),
        "bhh": u(ks[3], (1, 3 * E)),
        # Linear(E, E, bias=False) -> stored transposed (in, out)
        "w1_t": u(ks[4], (E, E)),
        "w2_t": u(ks[5], (E, E)),
        # Linear(E, 1, bias=False) -> weight row (1, E)
        "v": u(ks[6], (1, E)),
    }


if __name__ == "__main__":
    B, S, E = 4, 8, 128
    key = jax.random.PRNGKey(0)
    k_x, k_e, k_h, k_m, k_p = jax.random.split(key, 5)

    x = jax.random.normal(k_x, (B, E), jnp.float32)
    embs = jax.random.normal(k_e, (B, S, E), jnp.float32)
    hidden = jax.random.normal(k_h, (B, E), jnp.float32)
    mask = jax.random.uniform(k_m, (B, S)) < 0.25       # bool, True == masked
    params = init_params(k_p, E)

    logits, h_new = pointer_net_forward(x, embs, hidden, mask, params)
    jax.block_until_ready((logits, h_new))

    ref_logits, ref_h = _ref_forward(x, embs, hidden, mask, params)
    # bf16 weights/activations on the MXU -> compare with loosened tolerance.
    np.testing.assert_allclose(np.asarray(h_new), np.asarray(ref_h),
                               atol=5e-2, rtol=5e-2)
    np.testing.assert_allclose(np.asarray(logits), np.asarray(ref_logits),
                               atol=5e-2, rtol=5e-2)

    print("KERNEL_OK")
</pallas_src>

<mosaic_0001>
module attributes {stable_mosaic.version = 11 : i64} {
  func.func @_encode_kernel(%arg0: memref<8x8x128xbf16, #tpu.memory_space<vmem>>, %arg1: memref<128x128xbf16, #tpu.memory_space<vmem>>, %arg2: memref<8x8x128xbf16, #tpu.memory_space<vmem>>) attributes {dimension_semantics = [], scalar_prefetch = 0 : i64, scratch_operands = 0 : i64, tpu.core_type = #tpu.core_type<tc>} {
    %c0 = arith.constant 0 : index
    %c0_0 = arith.constant 0 : index
    %c0_1 = arith.constant 0 : index
    %0 = vector.load %arg0[%c0, %c0_0, %c0_1] : memref<8x8x128xbf16, #tpu.memory_space<vmem>>, vector<8x8x128xbf16>
    %1 = vector.shape_cast %0 : vector<8x8x128xbf16> to vector<64x128xbf16>
    %c0_2 = arith.constant 0 : index
    %c0_3 = arith.constant 0 : index
    %2 = vector.load %arg1[%c0_2, %c0_3] : memref<128x128xbf16, #tpu.memory_space<vmem>>, vector<128x128xbf16>
    %cst = arith.constant dense<0.000000e+00> : vector<64x128xf32>
    %3 = tpu.matmul %1, %2, %cst {dimension_numbers = #tpu.dot_dimension_numbers<[1], [0], [0], [1], [0, 0, 1, 1], [], []>} : vector<64x128xbf16>, vector<128x128xbf16>, vector<64x128xf32> -> vector<64x128xf32>
    %4 = vector.shape_cast %3 : vector<64x128xf32> to vector<8x8x128xf32>
    %5 = arith.truncf %4 : vector<8x8x128xf32> to vector<8x8x128xbf16>
    %c0_4 = arith.constant 0 : index
    %c0_5 = arith.constant 0 : index
    %c0_6 = arith.constant 0 : index
    %6 = vector.load %arg2[%c0_4, %c0_5, %c0_6] : memref<8x8x128xbf16, #tpu.memory_space<vmem>>, vector<8x8x128xbf16>
    tpu.vector_store %arg2[%c0_4, %c0_5, %c0_6], %5 {strides = array<i32>} : memref<8x8x128xbf16, #tpu.memory_space<vmem>>, vector<8x8x128xbf16>,
    return
  }
}

</mosaic_0001>

<bundles_post_ra>
// kernel: tpu_custom_call.1
= control target key start
LH: loop header
LB: loop body
LE: loop exit
PB: predicated region body
PF: predicated region fallthrough
CT: control target
= control target key end

     0   :  { %7 = vsyncpa [#allocation3], 0  ;;  %s477_s0 = inlined_call_operand.hbm [shape: bf16[8,8,128], index: 0, kind: input, shape index: {}]   ;;  %s478_s1 = inlined_call_operand.hbm [shape: bf16[128,128], index: 1, kind: input, shape index: {}]   ;;  %s479_s2 = inlined_call_operand.hbm [shape: bf16[8,8,128], index: 2, kind: output, shape index: {}]  }
   0x1   :  { %8 = vsyncpa [#allocation6], 0 }
   0x2   :  { %9 = vsyncpa [#allocation4], 0  ;;  %s412_s9 = smov [#allocation2]   ;;  %s340_s13 = scalar_lea.hbm %s477_s0, 512 }
   0x3   :  { %s15_s10 = sshll.u32 %s412_s9, 4  ;;  %p341_p0 = scmp.ne.s32.totalorder %s477_s0, %s340_s13  ;;  %s16_s10 = int_to_ptr.vmem [resolvable:$true] %s15_s10 }
   0x4   :  { %p344_p1 = scmp.lt.u32.totalorder %s340_s13, %s477_s0 }
   0x6   :  { %p346_p2 = pnand %p344_p1, %p341_p0 }
   0x8   :  { %349 = shalt.err (!%p346_p2)
}
   0x9   :  { %s350_s18 = scalar_lea.vmem %s16_s10, 512  ;;  %p355_p4 = scmp.lt.s32.totalorder %s16_s10, %s16_s10 }
   0xa   :  { %p351_p3 = scmp.ne.s32.totalorder %s16_s10, %s350_s18  ;;  %p356_p5 = scmp.lt.s32.totalorder %s350_s18, %s350_s18 }
   0xc   :  { %p357_p6 = por %p356_p5, %p355_p4 }
   0xe   :  { %p358_p7 = pnand %p357_p6, %p351_p3 }
  0x10   :  { %361 = shalt.err (!%p358_p7)
}
  0x11   :  { %s413_s19 = smov 64   ;;  %s414_s20 = smov 4  }
  0x12   :  { %21 = dma.hbm_to_vmem [thread:$0]  %s477_s0, 512, %s16_s10, [#allocation3], %s413_s19, %s413_s19, %s414_s20  }
  0x13   :  { %s415_s23 = smov [#allocation5]   ;;  %s362_s27 = scalar_lea.hbm %s478_s1, 1024 }
  0x14   :  { %s27_s24 = sshll.u32 %s415_s23, 4  ;;  %p363_p8 = scmp.ne.s32.totalorder %s478_s1, %s362_s27  ;;  %s28_s24 = int_to_ptr.vmem [resolvable:$true] %s27_s24 }
  0x15   :  { %p366_p9 = scmp.lt.u32.totalorder %s362_s27, %s478_s1 }
  0x17   :  { %p368_p10 = pnand %p366_p9, %p363_p8 }
  0x19   :  { %371 = shalt.err (!%p368_p10)
}
  0x1a   :  { %s372_s4 = scalar_lea.vmem %s28_s24, 1024  ;;  %p377_p12 = scmp.lt.s32.totalorder %s28_s24, %s28_s24 }
  0x1b   :  { %p373_p11 = scmp.ne.s32.totalorder %s28_s24, %s372_s4  ;;  %p378_p13 = scmp.lt.s32.totalorder %s372_s4, %s372_s4 }
  0x1d   :  { %p379_p0 = por %p378_p13, %p377_p12 }
  0x1f   :  { %p380_p1 = pnand %p379_p0, %p373_p11 }
  0x21   :  { %383 = shalt.err (!%p380_p1)
}
  0x22   :  { %33 = dma.hbm_to_vmem [thread:$0]  %s478_s1, 1024, %s28_s24, [#allocation6], %s413_s19, %s413_s19, %s414_s20  }
  0x23   :  { %406 = dma.done.wait [#allocation3], 512  }
  0x24   :  { %407 = vsyncadd [#allocation3], 4294966784 }
  0x25   :  { %408 = dma.done.wait [#allocation6], 1024  }
  0x26   :  { %409 = vsyncadd [#allocation6], 4294966272  ;;  %v328_v0 = vld [vmem:[#allocation5] sm:$0xff]   ;;  %v329_v1 = vld [vmem:[#allocation5 + $0x8] sm:$0xff]   ;;  %s416_s1 = smov [#allocation7]  }
  0x27   :  { %283 = vmatprep.subr.bf16.mxu0 %v328_v0  ;;  %307 = vmatprep.subr.bf16.mxu1 %v328_v0  ;;  %v330_v2 = vld [vmem:[#allocation5 + $0x10] sm:$0xff]   ;;  %v331_v3 = vld [vmem:[#allocation5 + $0x18] sm:$0xff]   ;;  %v336_v4 = vld [vmem:[#allocation2] sm:$0xff]   ;;  %s223_s6 = sshll.u32 %s416_s1, 4  ;;  %s224_s6 = int_to_ptr.vmem [resolvable:$true] %s223_s6 }
  0x28   :  { %284 = vmatpush3.bf16.msra.mxu0 %v328_v0  ;;  %315 = vmatpush3.bf16.msra.mxu1 %v328_v0  ;;  %v337_v5 = vld [vmem:[#allocation2 + $0x10] sm:$0xff]   ;;  %v332_v6 = vld [vmem:[#allocation5 + $0x20] sm:$0xff]   ;;  %v333_v7 = vld [vmem:[#allocation5 + $0x28] sm:$0xff]   ;;  %s384_s7 = scalar_lea.vmem %s224_s6, 512  ;;  %p389_p3 = scmp.lt.s32.totalorder %s224_s6, %s224_s6 }
  0x29   :  { %285 = vmatprep.subr.bf16.mxu0 %v329_v1  ;;  %308 = vmatprep.subr.bf16.mxu1 %v329_v1  ;;  %v334_v8 = vld [vmem:[#allocation5 + $0x30] sm:$0xff]   ;;  %v335_v9 = vld [vmem:[#allocation5 + $0x38] sm:$0xff]   ;;  %v338_v10 = vld [vmem:[#allocation2 + $0x8] sm:$0xff]   ;;  %p385_p2 = scmp.ne.s32.totalorder %s224_s6, %s384_s7  ;;  %p390_p4 = scmp.lt.s32.totalorder %s384_s7, %s384_s7 }
  0x2a   :  { %299 = vmatprep.mubr.bf16.mxu0 %v336_v4  ;;  %303 = vmatprep.mubr.bf16.mxu1 %v337_v5  ;;  %v339_v11 = vld [vmem:[#allocation2 + $0x18] sm:$0xff]  }
  0x2b   :  { %p391_p5 = por %p390_p4, %p389_p3 }
  0x2c   :  { %286 = vmatpush3.bf16.msra.mxu0 %v329_v1  ;;  %316 = vmatpush3.bf16.msra.mxu1 %v329_v1 }
  0x2d   :  { %287 = vmatprep.subr.bf16.mxu0 %v330_v2  ;;  %309 = vmatprep.subr.bf16.mxu1 %v330_v2  ;;  %p392_p6 = pnand %p391_p5, %p385_p2 }
  0x30   :  { %288 = vmatpush3.bf16.msra.mxu0 %v330_v2  ;;  %317 = vmatpush3.bf16.msra.mxu1 %v330_v2 }
  0x31   :  { %289 = vmatprep.subr.bf16.mxu0 %v331_v3  ;;  %310 = vmatprep.subr.bf16.mxu1 %v331_v3 }
  0x34   :  { %290 = vmatpush3.bf16.msra.mxu0 %v331_v3  ;;  %318 = vmatpush3.bf16.msra.mxu1 %v331_v3 }
  0x35   :  { %291 = vmatprep.subr.bf16.mxu0 %v332_v6  ;;  %311 = vmatprep.subr.bf16.mxu1 %v332_v6 }
  0x38   :  { %292 = vmatpush3.bf16.msra.mxu0 %v332_v6  ;;  %319 = vmatpush3.bf16.msra.mxu1 %v332_v6 }
  0x39   :  { %293 = vmatprep.subr.bf16.mxu0 %v333_v7  ;;  %312 = vmatprep.subr.bf16.mxu1 %v333_v7 }
  0x3c   :  { %294 = vmatpush3.bf16.msra.mxu0 %v333_v7  ;;  %320 = vmatpush3.bf16.msra.mxu1 %v333_v7 }
  0x3d   :  { %295 = vmatprep.subr.bf16.mxu0 %v334_v8  ;;  %313 = vmatprep.subr.bf16.mxu1 %v334_v8 }
  0x40   :  { %296 = vmatpush3.bf16.msra.mxu0 %v334_v8  ;;  %321 = vmatpush3.bf16.msra.mxu1 %v334_v8 }
  0x41   :  { %297 = vmatprep.subr.bf16.mxu0 %v335_v9  ;;  %314 = vmatprep.subr.bf16.mxu1 %v335_v9 }
  0x44   :  { %298 = vmatpush3.bf16.msra.mxu0 %v335_v9  ;;  %322 = vmatpush3.bf16.msra.mxu1 %v335_v9 }
  0x47   :  { %300 = vmatmul.mubr.bf16.vlgmr.msra.gmra.mrb[0].mxu0 %v338_v10  ;;  %304 = vmatmul.mubr.bf16.vlgmr.msra.gmra.mrb[0].mxu1 %v339_v11 }
 0x11a   :  { %v301_v12 = vpop.f32.mrb[0].mxu0  ;;  %v305_v13 = vpop.f32.mrb[0].mxu1 }
 0x11b   :  { %v171_v14 = vpop.f32.mrb[1].mxu0  ;;  %v187_v15 = vpop.f32.mrb[1].mxu1 }
 0x11c   :  { %v302_v16 = vpop.f32.mrb[2].mxu0  ;;  %v306_v17 = vpop.f32.mrb[2].mxu1 }
 0x11d   :  { %v256_v18 = vpack.c.bf16 %v302_v16, %v301_v12  ;;  %v266_v19 = vpack.c.bf16 %v306_v17, %v305_v13  ;;  %v174_v20 = vpop.f32.mrb[3].mxu0  ;;  %v190_v21 = vpop.f32.mrb[3].mxu1 }
 0x11e   :  { %v251_v22 = vpack.c.bf16 %v174_v20, %v171_v14  ;;  %v261_v23 = vpack.c.bf16 %v190_v21, %v187_v15 }
 0x11f   :  { %268 = vst [vmem:[#allocation7 + $0x8] sm:$0xff] %v256_v18   ;;  %270 = vst [vmem:[#allocation7 + $0x18] sm:$0xff] %v266_v19  }
 0x120   :  { %252 = vst [vmem:[#allocation7] sm:$0xff] %v251_v22   ;;  %269 = vst [vmem:[#allocation7 + $0x10] sm:$0xff] %v261_v23  }
 0x121   :  { %395 = shalt.err (!%p392_p6)
}
 0x122   :  { %s396_s10 = scalar_lea.hbm %s479_s2, 512 }
 0x123   :  { %p397_p7 = scmp.ne.s32.totalorder %s479_s2, %s396_s10  ;;  %p400_p8 = scmp.lt.u32.totalorder %s396_s10, %s479_s2 }
 0x125   :  { %p402_p9 = pnand %p400_p8, %p397_p7 }
 0x127   :  { %405 = shalt.err (!%p402_p9)
}
 0x128   :  { %229 = dma.vmem_to_hbm [thread:$0]  %s224_s6, 512, %s479_s2, [#allocation4], %s413_s19, %s413_s19, %s414_s20  }
 0x129   :  { %410 = dma.done.wait [#allocation4], 512  }
 0x12a   :  { %411 = vsyncadd [#allocation4], 4294966784 }
 0x12b   :  { %233 = vsyncpa [#allocation3], 1 }
 0x12c   :  { %234 = vsyncpa [#allocation6], 1 }
 0x12d   :  { %235 = vsyncpa [#allocation4], 1 }

</bundles_post_ra>
